<compile_context>
chip_gen: v7x
topology: tpu7x:2x2x1
jax: 0.10.0
libtpu: 0.0.40
codegen_flags: <defaults>
</compile_context>

<pallas_src>
import math
import functools

import jax
import jax.numpy as jnp
from jax import lax
from jax.experimental import pallas as pl
from jax.experimental.pallas import tpu as pltpu


# Above the 16 MiB (v5e) / 32 MiB (v6e, v7x) default scoped limits, with
# headroom under v7x's 64 MiB physical VMEM.
_VMEM_LIMIT_BYTES = 48 * 1024 * 1024


# ----------------------------------------------------------------------------
# Kernel 1: fused QKV projection.
# One wide (tm, K) @ (K, 3C) bf16 MXU pass per row tile; q/k/v written from
# lane slices of the single accumulator (weight & bias VMEM-resident).
# ----------------------------------------------------------------------------
def _qkv_kernel(x_ref, w_ref, b_ref, q_ref, k_ref, v_ref, *, model_dim):
    y = jnp.dot(x_ref[...], w_ref[...], preferred_element_type=jnp.float32)
    y = y + b_ref[...]                            # (tm, 3C), f32 accumulator
    C = model_dim
    q_ref[...] = y[:, :C].astype(q_ref.dtype)
    k_ref[...] = y[:, C:2 * C].astype(k_ref.dtype)
    v_ref[...] = y[:, 2 * C:].astype(v_ref.dtype)


def pallas_qkv_projection(x2d, w_fused, b_fused, *, block_m=512):
    """x2d: (M, K) bf16; w_fused: (K, 3C) bf16; b_fused: (1, 3C) f32."""
    M, K = x2d.shape
    N3 = w_fused.shape[1]
    C = N3 // 3
    tm = M if M <= block_m else block_m
    grid_m = pl.cdiv(M, tm)
    out_sds = jax.ShapeDtypeStruct((M, C), jnp.bfloat16)
    row_out = pl.BlockSpec((tm, C), lambda i: (i, 0))
    return pl.pallas_call(
        functools.partial(_qkv_kernel, model_dim=C),
        out_shape=(out_sds, out_sds, out_sds),
        grid_spec=pltpu.PrefetchScalarGridSpec(
            num_scalar_prefetch=0,
            grid=(grid_m,),
            in_specs=[
                pl.BlockSpec((tm, K), lambda i: (i, 0)),   # row tile (pipelined)
                pl.BlockSpec((K, N3), lambda i: (0, 0)),   # fused weight: resident
                pl.BlockSpec((1, N3), lambda i: (0, 0)),   # bias: resident
            ],
            out_specs=(row_out, row_out, row_out),
        ),
        compiler_params=pltpu.CompilerParams(
            dimension_semantics=("parallel",),
            vmem_limit_bytes=_VMEM_LIMIT_BYTES),
    )(x2d, w_fused, b_fused)


# ----------------------------------------------------------------------------
# Kernel 2: causal attention core + fused output projection.
# Grid = (batch, q-tile).  Heads are processed from lane-packed (tq, C) /
# (T, C) blocks; per-head outputs are concatenated into one lane-dense (tq, C)
# value, projected with the VMEM-resident w_out, and stored once.
# ----------------------------------------------------------------------------
def _attn_proj_kernel(q_ref, k_ref, v_ref, wo_ref, bo_ref, o_ref,
                      *, n_heads, head_dim, is_temporal):
    tq = q_ref.shape[1]
    T = k_ref.shape[1]

    q_all = q_ref[0]                              # (tq, C) bf16 (scale folded in)
    k_all = k_ref[0]                              # (T, C)  bf16
    v_all = v_ref[0]                              # (T, C)  bf16

    if is_temporal:
        # Additive causal mask generated in-kernel for this q tile (no HBM
        # mask input, no permanent VMEM residency).  Cheap VPU filler.
        row = lax.broadcasted_iota(jnp.int32, (tq, T), 0) + pl.program_id(1) * tq
        col = lax.broadcasted_iota(jnp.int32, (tq, T), 1)
        mask = jnp.where(col <= row, 0.0, -jnp.inf).astype(jnp.float32)

    head_outs = []
    for h in range(n_heads):                      # static unroll (small H)
        lo = h * head_dim
        hi = lo + head_dim
        q_h = q_all[:, lo:hi]                     # (tq, D) bf16
        k_h = k_all[:, lo:hi]                     # (T, D)  bf16
        v_h = v_all[:, lo:hi]                     # (T, D)  bf16

        # Scores: contract last dims directly -- no explicit k.T relayout.
        s = lax.dot_general(q_h, k_h, (((1,), (1,)), ((), ())),
                            preferred_element_type=jnp.float32)   # (tq, T)
        if is_temporal:
            s = s + mask

        m = jnp.max(s, axis=-1, keepdims=True)
        p = jnp.exp(s - m)
        denom = jnp.sum(p, axis=-1, keepdims=True)
        # PV matmul in bf16; normalize AFTER (tq*D instead of tq*T multiplies,
        # and no precision loss from normalizing p before the bf16 cast).
        o_h = jnp.dot(p.astype(jnp.bfloat16), v_h,
                      preferred_element_type=jnp.float32)          # (tq, D)
        head_outs.append(o_h * pl.reciprocal(denom, approx=True))

    att = jnp.concatenate(head_outs, axis=-1)     # (tq, C) f32, lane-dense

    # Fused output projection (w_out VMEM-resident): no extra HBM round trip.
    proj = jnp.dot(att.astype(jnp.bfloat16), wo_ref[...],
                   preferred_element_type=jnp.float32) + bo_ref[...]
    o_ref[0] = proj.astype(o_ref.dtype)           # single lane-dense store


def pallas_attention_output(q, k, v, w_out, b_out, *, n_heads, is_temporal,
                            out_dtype, block_q=256):
    """q, k, v: (B, T, C) bf16 with heads packed along C.  Returns (B, T, C)."""
    B, T, C = q.shape
    assert C % n_heads == 0
    D = C // n_heads
    tq = T if T <= block_q else block_q
    grid = (B, pl.cdiv(T, tq))
    kernel = functools.partial(_attn_proj_kernel, n_heads=n_heads,
                               head_dim=D, is_temporal=is_temporal)
    q_spec = pl.BlockSpec((1, tq, C), lambda b, i: (b, i, 0))
    kv_spec = pl.BlockSpec((1, T, C), lambda b, i: (b, 0, 0))
    return pl.pallas_call(
        kernel,
        out_shape=jax.ShapeDtypeStruct((B, T, C), out_dtype),
        grid_spec=pltpu.PrefetchScalarGridSpec(
            num_scalar_prefetch=0,
            grid=grid,
            in_specs=[
                q_spec, kv_spec, kv_spec,
                pl.BlockSpec((C, C), lambda b, i: (0, 0)),   # w_out: resident
                pl.BlockSpec((1, C), lambda b, i: (0, 0)),   # b_out: resident
            ],
            out_specs=pl.BlockSpec((1, tq, C), lambda b, i: (b, i, 0)),
        ),
        compiler_params=pltpu.CompilerParams(
            dimension_semantics=("parallel", "parallel"),
            vmem_limit_bytes=_VMEM_LIMIT_BYTES),
    )(q, k, v, w_out, b_out)


# ----------------------------------------------------------------------------
# One-time parameter preparation (outside the hot path):
#   * transpose PyTorch (out, in) weights into (K, N) matmul layout,
#   * fuse wq|wk|wv along N,
#   * fold the 1/sqrt(head_dim) softmax scale into the query columns,
#   * cast weights to bf16 (biases stay f32 for the accumulator add).
# ----------------------------------------------------------------------------
def prepare_params(params, n_heads):
    C = params["w_out"].shape[0]
    assert C % n_heads == 0
    scale = 1.0 / math.sqrt(C // n_heads)

    w_fused = jnp.asarray(params["w_qkv"], jnp.float32).T      # (C, 3C), [q|k|v]
    b_fused = jnp.asarray(params["b_qkv"], jnp.float32)        # (3C,)
    col_scale = jnp.concatenate([jnp.full((C,), scale, jnp.float32),
                                 jnp.ones((2 * C,), jnp.float32)])
    w_fused = w_fused * col_scale[None, :]
    b_fused = b_fused * col_scale

    return {
        "w_qkv_fused": w_fused.astype(jnp.bfloat16),           # (C, 3C)
        "b_qkv_fused": b_fused.reshape(1, 3 * C),               # (1, 3C) f32
        "w_out": jnp.asarray(params["w_out"], jnp.float32).T.astype(jnp.bfloat16),
        "b_out": jnp.asarray(params["b_out"], jnp.float32).reshape(1, C),
    }


def temporal_attention_forward(x, prepared, n_heads, is_temporal=True,
                               *, block_m=512, block_q=256):
    """x: (B, T, C) -> (B, T, C).  Dropout layers are identity (eval mode)."""
    B, T, C = x.shape
    x2d = x.reshape(B * T, C).astype(jnp.bfloat16)

    q2d, k2d, v2d = pallas_qkv_projection(
        x2d, prepared["w_qkv_fused"], prepared["b_qkv_fused"], block_m=block_m)

    # Heads stay packed along the lane axis: pure metadata reshapes only.
    q = q2d.reshape(B, T, C)
    k = k2d.reshape(B, T, C)
    v = v2d.reshape(B, T, C)

    return pallas_attention_output(
        q, k, v, prepared["w_out"], prepared["b_out"],
        n_heads=n_heads, is_temporal=is_temporal,
        out_dtype=x.dtype, block_q=block_q)


# Pure-JAX (f32) reference for correctness checking.
def temporal_attention_reference(x, params, n_heads, is_temporal=True):
    B, T, C = x.shape
    H = n_heads
    D = C // H
    qkv = x @ params["w_qkv"].T + params["b_qkv"]
    q, k, v = jnp.split(qkv, 3, axis=2)
    q = q.reshape(B, T, H, D).transpose(0, 2, 1, 3)
    k = k.reshape(B, T, H, D).transpose(0, 2, 1, 3)
    v = v.reshape(B, T, H, D).transpose(0, 2, 1, 3)
    att = (q @ jnp.swapaxes(k, -2, -1)) * (1.0 / math.sqrt(D))
    if is_temporal:
        tri = jnp.tril(jnp.ones((T, T), dtype=bool))
        att = jnp.where(tri[None, None], att, -jnp.inf)
    att = jax.nn.softmax(att, axis=-1)
    out = att @ v
    out = out.transpose(0, 2, 1, 3).reshape(B, T, C)
    return out @ params["w_out"].T + params["b_out"]


if __name__ == "__main__":
    # neuroConfig: neuronDensity=32, parallelAttentionPathways=4,
    #              memorySpan>=T, useBias=True, dropoutRate=0.0 (eval mode).
    B, T, C, H = 2, 8, 32, 4

    key = jax.random.PRNGKey(0)
    k_x, k_wq, k_bq, k_wo, k_bo = jax.random.split(key, 5)

    x = jax.random.normal(k_x, (B, T, C), dtype=jnp.float32)

    params = {
        # PyTorch Linear weight shapes: keyQueryValueProjection (3C, C),
        # outputProjection (C, C).
        "w_qkv": jax.random.normal(k_wq, (3 * C, C), dtype=jnp.float32) * 0.02,
        "b_qkv": jax.random.normal(k_bq, (3 * C,), dtype=jnp.float32) * 0.02,
        "w_out": jax.random.normal(k_wo, (C, C), dtype=jnp.float32) * 0.02,
        "b_out": jax.random.normal(k_bo, (C,), dtype=jnp.float32) * 0.02,
    }

    prepared = prepare_params(params, n_heads=H)

    out = temporal_attention_forward(x, prepared, n_heads=H, is_temporal=True)
    out = jax.block_until_ready(out)

    ref = temporal_attention_reference(x, params, n_heads=H, is_temporal=True)
    assert out.shape == (B, T, C)
    # Tolerance accounts for bf16 MXU operands + the approximate (EUP)
    # reciprocal in the softmax normalization.
    max_err = float(jnp.max(jnp.abs(out - ref)))
    assert jnp.allclose(out, ref, atol=2e-2, rtol=2e-2), (
        f"mismatch vs reference, max abs err {max_err}")

    print("KERNEL_OK")
</pallas_src>

<mosaic_0001>
module attributes {stable_mosaic.version = 11 : i64} {
  func.func @_qkv_kernel(%arg0: i32, %arg1: memref<16x32xbf16, #tpu.memory_space<vmem>>, %arg2: memref<32x96xbf16, #tpu.memory_space<vmem>>, %arg3: memref<1x96xf32, #tpu.memory_space<vmem>>, %arg4: memref<16x32xbf16, #tpu.memory_space<vmem>>, %arg5: memref<16x32xbf16, #tpu.memory_space<vmem>>, %arg6: memref<16x32xbf16, #tpu.memory_space<vmem>>) attributes {dimension_semantics = [#tpu.dimension_semantics<parallel>], iteration_bounds = array<i64: 1>, scalar_prefetch = 0 : i64, scratch_operands = 0 : i64, tpu.core_type = #tpu.core_type<tc>, window_params = [{transform_indices = @transform_0, window_bounds = array<i64: 16, 32>}, {pipeline_mode = #tpu.pipeline_mode<synchronous>, transform_indices = @transform_1, window_bounds = array<i64: 32, 96>}, {pipeline_mode = #tpu.pipeline_mode<synchronous>, transform_indices = @transform_2, window_bounds = array<i64: 1, 96>}, {transform_indices = @transform_3, window_bounds = array<i64: 16, 32>}, {transform_indices = @transform_4, window_bounds = array<i64: 16, 32>}, {transform_indices = @transform_5, window_bounds = array<i64: 16, 32>}]} {
    %c0 = arith.constant 0 : index
    %c0_0 = arith.constant 0 : index
    %0 = vector.load %arg1[%c0, %c0_0] : memref<16x32xbf16, #tpu.memory_space<vmem>>, vector<16x32xbf16>
    %c0_1 = arith.constant 0 : index
    %c0_2 = arith.constant 0 : index
    %1 = vector.load %arg2[%c0_1, %c0_2] : memref<32x96xbf16, #tpu.memory_space<vmem>>, vector<32x96xbf16>
    %cst = arith.constant dense<0.000000e+00> : vector<16x96xf32>
    %2 = tpu.matmul %0, %1, %cst {dimension_numbers = #tpu.dot_dimension_numbers<[1], [0], [0], [1], [0, 0, 1, 1], [], []>} : vector<16x32xbf16>, vector<32x96xbf16>, vector<16x96xf32> -> vector<16x96xf32>
    %c0_3 = arith.constant 0 : index
    %c0_4 = arith.constant 0 : index
    %3 = vector.load %arg3[%c0_3, %c0_4] : memref<1x96xf32, #tpu.memory_space<vmem>>, vector<1x96xf32>
    %4 = vector.broadcast %3 : vector<1x96xf32> to vector<16x96xf32>
    %5 = arith.addf %2, %4 : vector<16x96xf32>
    %6 = vector.extract_strided_slice %5 {offsets = [0, 0], sizes = [16, 32], strides = [1, 1]} : vector<16x96xf32> to vector<16x32xf32>
    %7 = arith.truncf %6 : vector<16x32xf32> to vector<16x32xbf16>
    %c0_5 = arith.constant 0 : index
    %c0_6 = arith.constant 0 : index
    %8 = vector.load %arg4[%c0_5, %c0_6] : memref<16x32xbf16, #tpu.memory_space<vmem>>, vector<16x32xbf16>
    tpu.vector_store %arg4[%c0_5, %c0_6], %7 {strides = array<i32>} : memref<16x32xbf16, #tpu.memory_space<vmem>>, vector<16x32xbf16>,
    %9 = vector.extract_strided_slice %5 {offsets = [0, 32], sizes = [16, 32], strides = [1, 1]} : vector<16x96xf32> to vector<16x32xf32>
    %10 = arith.truncf %9 : vector<16x32xf32> to vector<16x32xbf16>
    %c0_7 = arith.constant 0 : index
    %c0_8 = arith.constant 0 : index
    %11 = vector.load %arg5[%c0_7, %c0_8] : memref<16x32xbf16, #tpu.memory_space<vmem>>, vector<16x32xbf16>
    tpu.vector_store %arg5[%c0_7, %c0_8], %10 {strides = array<i32>} : memref<16x32xbf16, #tpu.memory_space<vmem>>, vector<16x32xbf16>,
    %12 = vector.extract_strided_slice %5 {offsets = [0, 64], sizes = [16, 32], strides = [1, 1]} : vector<16x96xf32> to vector<16x32xf32>
    %13 = arith.truncf %12 : vector<16x32xf32> to vector<16x32xbf16>
    %c0_9 = arith.constant 0 : index
    %c0_10 = arith.constant 0 : index
    %14 = vector.load %arg6[%c0_9, %c0_10] : memref<16x32xbf16, #tpu.memory_space<vmem>>, vector<16x32xbf16>
    tpu.vector_store %arg6[%c0_9, %c0_10], %13 {strides = array<i32>} : memref<16x32xbf16, #tpu.memory_space<vmem>>, vector<16x32xbf16>,
    return
  }
  func.func @transform_0(%arg0: i32) -> (i32, i32) {
    %c0_i32 = arith.constant 0 : i32
    %c0_i32_0 = arith.constant 0 : i32
    return %arg0, %c0_i32 : i32, i32
  }
  func.func @transform_1(%arg0: i32) -> (i32, i32) {
    %c0_i32 = arith.constant 0 : i32
    %c0_i32_0 = arith.constant 0 : i32
    %c0_i32_1 = arith.constant 0 : i32
    return %c0_i32, %c0_i32_0 : i32, i32
  }
  func.func @transform_2(%arg0: i32) -> (i32, i32) {
    %c0_i32 = arith.constant 0 : i32
    %c0_i32_0 = arith.constant 0 : i32
    %c0_i32_1 = arith.constant 0 : i32
    return %c0_i32, %c0_i32_0 : i32, i32
  }
  func.func @transform_3(%arg0: i32) -> (i32, i32) {
    %c0_i32 = arith.constant 0 : i32
    %c0_i32_0 = arith.constant 0 : i32
    return %arg0, %c0_i32 : i32, i32
  }
  func.func @transform_4(%arg0: i32) -> (i32, i32) {
    %c0_i32 = arith.constant 0 : i32
    %c0_i32_0 = arith.constant 0 : i32
    return %arg0, %c0_i32 : i32, i32
  }
  func.func @transform_5(%arg0: i32) -> (i32, i32) {
    %c0_i32 = arith.constant 0 : i32
    %c0_i32_0 = arith.constant 0 : i32
    return %arg0, %c0_i32 : i32, i32
  }
}

</mosaic_0001>

<bundles_post_ra>
// kernel: tpu_custom_call.1
= control target key start
LH: loop header
LB: loop body
LE: loop exit
PB: predicated region body
PF: predicated region fallthrough
CT: control target
= control target key end

     0   :  { %11 = vsyncpa [#allocation3], 0  ;;  %s483_s0 = inlined_call_operand.hbm [shape: bf16[16,32], index: 0, kind: input, shape index: {}]   ;;  %s484_s1 = inlined_call_operand.hbm [shape: bf16[32,96], index: 1, kind: input, shape index: {}]   ;;  %s485_s2 = inlined_call_operand.vmem [shape: f32[1,96], index: 2, kind: input, shape index: {}]   ;;  %s486_s3 = inlined_call_operand.hbm [shape: bf16[16,32], index: 3, kind: output, shape index: {0}]   ;;  %s487_s4 = inlined_call_operand.hbm [shape: bf16[16,32], index: 4, kind: output, shape index: {1}]   ;;  %s488_s5 = inlined_call_operand.hbm [shape: bf16[16,32], index: 5, kind: output, shape index: {2}]  }
   0x1   :  { %12 = vsyncpa [#allocation6], 0 }
   0x2   :  { %13 = vsyncpa [#allocation4], 0 }
   0x3   :  { %14 = vsyncpa [#allocation9], 0  ;;  %s350_s18 = smov [#allocation2]   ;;  %s232_s22 = scalar_lea.hbm %s483_s0, 128 }
   0x4   :  { %s20_s19 = sshll.u32 %s350_s18, 4  ;;  %p233_p0 = scmp.ne.s32.totalorder %s483_s0, %s232_s22  ;;  %s21_s19 = int_to_ptr.vmem [resolvable:$true] %s20_s19 }
   0x5   :  { %p236_p1 = scmp.lt.u32.totalorder %s232_s22, %s483_s0 }
   0x7   :  { %p238_p2 = pnand %p236_p1, %p233_p0 }
   0x9   :  { %241 = shalt.err (!%p238_p2)
}
   0xa   :  { %s242_s27 = scalar_lea.vmem %s21_s19, 128  ;;  %p247_p4 = scmp.lt.s32.totalorder %s21_s19, %s21_s19 }
   0xb   :  { %p243_p3 = scmp.ne.s32.totalorder %s21_s19, %s242_s27  ;;  %p248_p5 = scmp.lt.s32.totalorder %s242_s27, %s242_s27 }
   0xd   :  { %p249_p6 = por %p248_p5, %p247_p4 }
   0xf   :  { %p250_p7 = pnand %p249_p6, %p243_p3 }
  0x11   :  { %253 = shalt.err (!%p250_p7)
}
  0x12   :  { %s351_s28 = smov 64   ;;  %s352_s29 = smov 4  }
  0x13   :  { %26 = dma.hbm_to_vmem [thread:$0]  %s483_s0, 128, %s21_s19, [#allocation3], %s351_s28, %s351_s28, %s352_s29  }
  0x14   :  { %s353_s7 = smov [#allocation5]   ;;  %s254_s11 = scalar_lea.hbm %s484_s1, 256 }
  0x15   :  { %s32_s8 = sshll.u32 %s353_s7, 4  ;;  %p255_p8 = scmp.ne.s32.totalorder %s484_s1, %s254_s11  ;;  %s33_s8 = int_to_ptr.vmem [resolvable:$true] %s32_s8 }
  0x16   :  { %p258_p9 = scmp.lt.u32.totalorder %s254_s11, %s484_s1 }
  0x18   :  { %p260_p10 = pnand %p258_p9, %p255_p8 }
  0x1a   :  { %263 = shalt.err (!%p260_p10)
}
  0x1b   :  { %s264_s16 = scalar_lea.vmem %s33_s8, 256  ;;  %p269_p12 = scmp.lt.s32.totalorder %s33_s8, %s33_s8 }
  0x1c   :  { %p265_p11 = scmp.ne.s32.totalorder %s33_s8, %s264_s16  ;;  %p270_p13 = scmp.lt.s32.totalorder %s264_s16, %s264_s16 }
  0x1e   :  { %p271_p0 = por %p270_p13, %p269_p12 }
  0x20   :  { %p272_p1 = pnand %p271_p0, %p265_p11 }
  0x22   :  { %275 = shalt.err (!%p272_p1)
}
  0x23   :  { %38 = dma.hbm_to_vmem [thread:$0]  %s484_s1, 256, %s33_s8, [#allocation6], %s351_s28, %s351_s28, %s352_s29  }
  0x24   :  { %342 = dma.done.wait [#allocation3], 128  }
  0x25   :  { %343 = vsyncadd [#allocation3], 4294967168 }
  0x26   :  { %344 = dma.done.wait [#allocation6], 256  }
  0x27   :  { %345 = vsyncadd [#allocation6], 4294967040  ;;  %v354_v0 = vmov 0.0   ;;  %vm355_vm0 = vmmov 0   ;;  %v229_v1 = vld [vmem:[#allocation5] sm:$0xff]   ;;  %v230_v2 = vld [vmem:[#allocation5 + $0x8] sm:$0xff]  }
  0x28   :  { %211 = vmatprep.subr.bf16.mxu0 %v354_v0  ;;  %215 = vmatprep.mubr.msk.bf16.mxu0 %vm355_vm0, %v354_v0  ;;  %v231_v3 = vld [vmem:[#allocation2] sm:$0xff]   ;;  %vm78_vm1 = vcmask 261120   ;;  %vm131_vm2 = vcmask 257024   ;;  %s356_s1 = smov [#allocation7]   ;;  %s357_s21 = smov 96  }
  0x29   :  { %212 = vmatpush3.bf16.msra.mxu0 %v229_v1  ;;  %v199_v4 = vld [vmem:[%s485_s2] ss:$0 sm:$0xff]  ;;  %s155_s20 = sshll.u32 %s356_s1, 4  ;;  %s156_s20 = int_to_ptr.vmem [resolvable:$true] %s155_s20 }
  0x2a   :  { %213 = vmatprep.subr.bf16.mxu0 %v354_v0  ;;  %s276_s2 = scalar_lea.vmem %s156_s20, 128  ;;  %p281_p3 = scmp.lt.s32.totalorder %s156_s20, %s156_s20 }
  0x2b   :  { %p277_p2 = scmp.ne.s32.totalorder %s156_s20, %s276_s2  ;;  %p282_p4 = scmp.lt.s32.totalorder %s276_s2, %s276_s2 }
  0x2d   :  { %214 = vmatpush3.bf16.msra.mxu0 %v230_v2  ;;  %p283_p5 = por %p282_p4, %p281_p3 }
  0x2f   :  { %p284_p6 = pnand %p283_p5, %p277_p2 }
  0x30   :  { %216 = vmatmul.mubr.msk.bf16.vlgmr.msra.gmra.mrb[0].mxu0 %vm78_vm1, %v231_v3 }
 0x103   :  { %v116_v5 = vpop.f32.mrb[0].mxu0 }
 0x104   :  { %v117_v6 = vadd.f32 %v199_v4, %v116_v5  ;;  %v217_v7 = vpop.f32.mrb[1].mxu0 }
 0x105   :  { %v119_v8 = vpop.f32.mrb[2].mxu0 }
 0x106   :  { %v206_v9 = vpack.c.bf16 %v117_v6, %v117_v6  ;;  %v120_v10 = vadd.f32 %v199_v4, %v119_v8  ;;  %v218_v11 = vpop.f32.mrb[3].mxu0 }
 0x108   :  { %v207_v12 = vpack.c.bf16 %v120_v10, %v120_v10  ;;  %142 = vrot.lane.b32.xlu1 %v206_v9, %s351_s28  ;;  %134 = vrot.lane.b32.xlu0 %v206_v9, %s357_s21  ;;  %132 = vst.msk [vmem:[#allocation7] sm:$0xf] %vm131_vm2, %v206_v9 }
 0x10a   :  { %133 = vst.msk [vmem:[#allocation7 + $0x4] sm:$0xf] %vm131_vm2, %v207_v12 }
 0x10b   :  { %287 = shalt.err (!%p284_p6)
}
 0x10c   :  { %s288_s24 = scalar_lea.hbm %s486_s3, 128 }
 0x10d   :  { %p289_p7 = scmp.ne.s32.totalorder %s486_s3, %s288_s24  ;;  %p292_p8 = scmp.lt.u32.totalorder %s288_s24, %s486_s3 }
 0x10f   :  { %p294_p9 = pnand %p292_p8, %p289_p7 }
 0x111   :  { %297 = shalt.err (!%p294_p9)
}
 0x112   :  { %161 = dma.vmem_to_hbm [thread:$0]  %s156_s20, 128, %s486_s3, [#allocation4], %s351_s28, %s351_s28, %s352_s29  }
 0x113   :  { %144 = vrot.lane.b32.xlu1 %v207_v12, %s351_s28  ;;  %136 = vrot.lane.b32.xlu0 %v207_v12, %s357_s21  ;;  %s358_s8 = smov [#allocation8]   ;;  %s359_s10 = smov [#allocation10]  }
 0x114   :  { %s167_s9 = sshll.u32 %s358_s8, 4  ;;  %s179_s11 = sshll.u32 %s359_s10, 4  ;;  %s168_s9 = int_to_ptr.vmem [resolvable:$true] %s167_s9  ;;  %s444_s11 = int_to_ptr.vmem [resolvable:$true] %s179_s11 }
 0x115   :  { %s298_s3 = scalar_lea.vmem %s168_s9, 128  ;;  %p303_p11 = scmp.lt.s32.totalorder %s168_s9, %s168_s9 }
 0x116   :  { %p299_p10 = scmp.ne.s32.totalorder %s168_s9, %s298_s3  ;;  %p304_p12 = scmp.lt.s32.totalorder %s298_s3, %s298_s3 }
 0x118   :  { %p305_p13 = por %p304_p12, %p303_p11 }
 0x11a   :  { %p306_p0 = pnand %p305_p13, %p299_p10 }
 0x17a   :  { %v143_v13 = vpop.permute.xlu1 %142  ;;  %v135_v14 = vpop.permute.xlu0 %134 }
 0x17b   :  { %148 = vst.msk [vmem:[#allocation10] sm:$0xf] %vm131_vm2, %v143_v13  ;;  %140 = vst.msk [vmem:[#allocation8] sm:$0xf] %vm131_vm2, %v135_v14 }
 0x185   :  { %v145_v15 = vpop.permute.xlu1 %144  ;;  %v137_v16 = vpop.permute.xlu0 %136 }
 0x186   :  { %149 = vst.msk [vmem:[#allocation10 + $0x4] sm:$0xf] %vm131_vm2, %v145_v15  ;;  %141 = vst.msk [vmem:[#allocation8 + $0x4] sm:$0xf] %vm131_vm2, %v137_v16 }
 0x187   :  { %309 = shalt.err (!%p306_p0)
}
 0x188   :  { %s310_s14 = scalar_lea.hbm %s487_s4, 128 }
 0x189   :  { %p311_p1 = scmp.ne.s32.totalorder %s487_s4, %s310_s14  ;;  %p314_p2 = scmp.lt.u32.totalorder %s310_s14, %s487_s4 }
 0x18b   :  { %p316_p3 = pnand %p314_p2, %p311_p1 }
 0x18d   :  { %319 = shalt.err (!%p316_p3)
}
 0x18e   :  { %173 = dma.vmem_to_hbm [thread:$0]  %s168_s9, 128, %s487_s4, [#allocation9], %s351_s28, %s351_s28, %s352_s29  }
 0x18f   :  { %s320_s1 = scalar_lea.vmem %s444_s11, 128  ;;  %p325_p5 = scmp.lt.s32.totalorder %s444_s11, %s444_s11 }
 0x190   :  { %p321_p4 = scmp.ne.s32.totalorder %s444_s11, %s320_s1  ;;  %p326_p6 = scmp.lt.s32.totalorder %s320_s1, %s320_s1 }
 0x192   :  { %p327_p7 = por %p326_p6, %p325_p5 }
 0x194   :  { %p328_p8 = pnand %p327_p7, %p321_p4 }
 0x196   :  { %331 = shalt.err (!%p328_p8)
}
 0x197   :  { %s332_s2 = scalar_lea.hbm %s488_s5, 128 }
 0x198   :  { %p333_p9 = scmp.ne.s32.totalorder %s488_s5, %s332_s2  ;;  %p336_p10 = scmp.lt.u32.totalorder %s332_s2, %s488_s5 }
 0x19a   :  { %p338_p11 = pnand %p336_p10, %p333_p9 }
 0x19c   :  { %341 = shalt.err (!%p338_p11)
}
 0x19d   :  { %185 = dma.vmem_to_hbm [thread:$0]  %s444_s11, 128, %s488_s5, [#allocation9], %s351_s28, %s351_s28, %s352_s29  }
 0x19e   :  { %346 = dma.done.wait [#allocation4], 128  }
 0x19f   :  { %347 = vsyncadd [#allocation4], 4294967168 }
 0x1a0   :  { %348 = dma.done.wait [#allocation9], 256  }
 0x1a1   :  { %349 = vsyncadd [#allocation9], 4294967040 }
 0x1a2   :  { %195 = vsyncpa [#allocation3], 1 }
 0x1a3   :  { %196 = vsyncpa [#allocation6], 1 }
 0x1a4   :  { %197 = vsyncpa [#allocation4], 1 }
 0x1a5   :  { %198 = vsyncpa [#allocation9], 1 }

</bundles_post_ra>
